<compile_context>
chip_gen: v6e
topology: v6e:2x2x1
jax: 0.10.0
libtpu: 0.0.40
codegen_flags: <defaults>
</compile_context>

<pallas_src>
import functools
import math
import random as pyrandom

import jax
import jax.numpy as jnp
from jax import lax
from jax.experimental import pallas as pl
from jax.experimental.pallas import tpu as pltpu


# ------------------------------- kernels ------------------------------------

def _hflip_kernel(x_ref, o_ref):
    """Horizontal flip (reverse W) as a single big matmul with the
    anti-diagonal permutation, built in-kernel (no extra HBM input)."""
    TB, H, W = x_ref.shape
    x2 = x_ref[...].reshape(TB * H, W)
    ii = lax.broadcasted_iota(jnp.int32, (W, W), 0)
    jj = lax.broadcasted_iota(jnp.int32, (W, W), 1)
    rev = (ii + jj == W - 1).astype(x2.dtype)
    y = jnp.dot(x2, rev, preferred_element_type=jnp.float32)
    o_ref[...] = y.reshape(TB, H, W).astype(o_ref.dtype)


def _vflip_kernel(x_ref, o_ref):
    """Vertical flip (reverse H): H static row copies, exact, no MXU."""
    # TODO(synk): per-row copies are sublane-sparse for large H; a lane-dense
    # sublane reversal would be preferable if/when lax.rev is guaranteed.
    _, H, _ = x_ref.shape
    for i in range(H):
        o_ref[:, i:i + 1, :] = x_ref[:, H - 1 - i:H - i, :]


def _translate_kernel(x_ref, o_ref, tmp_ref, *, sy, fy, sx, fx):
    """Pure translation, bilinear resampling, zero padding, as two separable
    shift-and-blend passes (all shifts are static Python ints):
        tmp[.., j]    = (1-fx)*x[.., j+sx]    + fx*x[.., j+sx+1]
        out[.., i, :] = (1-fy)*tmp[.., i+sy, :] + fy*tmp[.., i+sy+1, :]
    """
    TB, H, W = x_ref.shape
    x = x_ref[...].astype(jnp.float32)

    # ---- column (W / lane) pass into the f32 VMEM scratch ----
    tmp_ref[...] = jnp.zeros_like(tmp_ref)
    for s, w in ((sx, 1.0 - fx), (sx + 1, fx)):
        if w == 0.0:
            continue
        dst_lo = max(0, -s)
        n = min(W, W - s) - dst_lo
        if n <= 0:
            continue
        src_lo = dst_lo + s
        tmp_ref[:, :, dst_lo:dst_lo + n] = (
            tmp_ref[:, :, dst_lo:dst_lo + n] + w * x[:, :, src_lo:src_lo + n])

    # ---- row (H / sublane) pass into the output ----
    t = tmp_ref[...]
    o_ref[...] = jnp.zeros_like(o_ref)
    for s, w in ((sy, 1.0 - fy), (sy + 1, fy)):
        if w == 0.0:
            continue
        dst_lo = max(0, -s)
        n = min(H, H - s) - dst_lo
        if n <= 0:
            continue
        src_lo = dst_lo + s
        cur = o_ref[:, dst_lo:dst_lo + n, :].astype(jnp.float32)
        o_ref[:, dst_lo:dst_lo + n, :] = (
            cur + w * t[:, src_lo:src_lo + n, :]).astype(o_ref.dtype)


# ---------------------------- pallas_call wrapper ----------------------------

_TARGET_TILE_BYTES = 4 * 1024 * 1024   # ~4 MiB per x/out tile (double-buffered
                                       # + f32 scratch stays well under 48 MiB)


def _pick_tb(num_planes, h, w, itemsize):
    plane_bytes = h * w * itemsize
    tb = max(1, _TARGET_TILE_BYTES // plane_bytes)
    return int(min(num_planes, tb))


def _warp_planes(xf, mode, params):
    """xf: (P, H, W) stack of image planes; applies the selected warp."""
    P, H, W = xf.shape
    itemsize = jnp.dtype(xf.dtype).itemsize
    TB = _pick_tb(P, H, W, itemsize)
    grid = (pl.cdiv(P, TB),)

    scratch = []
    if mode == "translate":
        kernel = functools.partial(_translate_kernel, **params)
        scratch = [pltpu.VMEM((TB, H, W), jnp.float32)]
        flops = 8 * P * H * W
    elif mode == "hflip":
        kernel = _hflip_kernel
        flops = 2 * P * H * W * W
    elif mode == "vflip":
        kernel = _vflip_kernel
        flops = 0
    else:
        raise ValueError(mode)

    return pl.pallas_call(
        kernel,
        out_shape=jax.ShapeDtypeStruct((P, H, W), xf.dtype),
        grid_spec=pltpu.PrefetchScalarGridSpec(
            num_scalar_prefetch=0,
            grid=grid,
            in_specs=[pl.BlockSpec((TB, H, W), lambda i: (i, 0, 0))],
            out_specs=pl.BlockSpec((TB, H, W), lambda i: (i, 0, 0)),
            scratch_shapes=scratch),
        compiler_params=pltpu.CompilerParams(
            dimension_semantics=("parallel",),      # independent plane blocks
            vmem_limit_bytes=48 * 1024 * 1024),
        cost_estimate=pl.CostEstimate(
            flops=int(flops), transcendentals=0,
            bytes_accessed=int(2 * P * H * W * itemsize)),
    )(xf)


# --------------------------- parameter sampling ------------------------------

def _translate_params(ty, tx):
    """Bilinear shift decomposition matching the RandomAffine translation."""
    dy = -float(ty); sy = math.floor(dy); fy = dy - sy
    dx = -float(tx); sx = math.floor(dx); fx = dx - sx
    return dict(sy=int(sy), fy=float(fy), sx=int(sx), fx=float(fx))


# ------------------------------ All.forward ----------------------------------

def _flatten_planes(t):
    return t.reshape(-1, t.shape[-2], t.shape[-1])


def all_forward(input_tensor, other_tensor=None, seed=0):
    """Equivalent of All().forward: randomly picks Flip (h/v, p=1.0) or a
    RandomAffine pure translation and applies the SAME transform to
    other_tensor (array or list) if given."""
    rng = pyrandom.Random(seed)   # deterministic stand-in for torch `random()`
    _, _, H, W = input_tensor.shape

    use_flip = rng.choice([True, False])          # choice([Flip, Translate])
    if use_flip:
        mode = "hflip" if rng.random() >= 0.5 else "vflip"
        params = {}
    else:
        tx = rng.uniform(-0.3 * W, 0.3 * W)
        ty = rng.uniform(-0.3 * H, 0.3 * H)
        mode, params = "translate", _translate_params(ty, tx)

    is_list = isinstance(other_tensor, list)
    others = list(other_tensor) if is_list else (
        [other_tensor] if other_tensor is not None else [])
    tensors = [input_tensor] + others

    # One fused pallas_call over every tensor that shares (H, W, dtype): pays
    # launch + pipeline warm-up once instead of per tensor.
    flats = [_flatten_planes(t) for t in tensors]
    fusable = all(f.shape[1:] == flats[0].shape[1:] and f.dtype == flats[0].dtype
                  for f in flats)
    if fusable and len(flats) > 1:
        fused = jnp.concatenate(flats, axis=0)
        warped = _warp_planes(fused, mode, params)
        outs, off = [], 0
        for t, f in zip(tensors, flats):
            outs.append(warped[off:off + f.shape[0]].reshape(t.shape))
            off += f.shape[0]
    else:
        outs = [_warp_planes(f, mode, params).reshape(t.shape)
                for t, f in zip(tensors, flats)]

    if other_tensor is None:
        return outs[0]
    return (outs[0], outs[1:]) if is_list else (outs[0], outs[1])


# ------------------------------ references -----------------------------------

def _row_matrix(h, sy, fy):
    return ((1.0 - fy) * jnp.eye(h, k=sy, dtype=jnp.float32)
            + fy * jnp.eye(h, k=sy + 1, dtype=jnp.float32))


def _col_matrix(w, sx, fx):
    return ((1.0 - fx) * jnp.eye(w, k=-sx, dtype=jnp.float32)
            + fx * jnp.eye(w, k=-(sx + 1), dtype=jnp.float32))


def _reference(x_nchw, mode, params):
    if mode == "hflip":
        return x_nchw[..., ::-1]
    if mode == "vflip":
        return x_nchw[..., ::-1, :]
    H, W = x_nchw.shape[-2:]
    a = _row_matrix(H, params["sy"], params["fy"])
    b = _col_matrix(W, params["sx"], params["fx"])
    return jnp.einsum("ij,ncjk,kl->ncil", a, x_nchw, b)


if __name__ == "__main__":
    key = jax.random.PRNGKey(0)
    k1, k2, k3 = jax.random.split(key, 3)
    x = jax.random.normal(k1, (2, 4, 16, 16), dtype=jnp.float32)
    y = jax.random.normal(k2, (2, 4, 16, 16), dtype=jnp.float32)
    z = jax.random.normal(k3, (2, 4, 16, 16), dtype=jnp.float32)

    # Module forward once (deterministically seeded transform choice).
    out = jax.block_until_ready(all_forward(x, seed=0))
    assert out.shape == x.shape and out.dtype == x.dtype

    # Check every transform the module can pick against a pure-JAX reference.
    for mode, params in (
            ("hflip", {}),
            ("vflip", {}),
            ("translate", _translate_params(ty=2.3, tx=-1.7)),
            ("translate", _translate_params(ty=-4.0, tx=0.6))):
        got = _warp_planes(_flatten_planes(x), mode, params).reshape(x.shape)
        want = _reference(x, mode, params)
        assert jnp.allclose(got, want, atol=1e-5, rtol=1e-5), mode

    # Exercise the fused other_tensor (list) path across a few seeds so both
    # the flip and translate branches are hit end-to-end.
    for s in range(4):
        out_s, others_s = all_forward(x, [y, z], seed=s)
        rng = pyrandom.Random(s)
        if rng.choice([True, False]):
            mode = "hflip" if rng.random() >= 0.5 else "vflip"
            params = {}
        else:
            tx = rng.uniform(-0.3 * 16, 0.3 * 16)
            ty = rng.uniform(-0.3 * 16, 0.3 * 16)
            mode, params = "translate", _translate_params(ty, tx)
        assert jnp.allclose(out_s, _reference(x, mode, params), atol=1e-5, rtol=1e-5)
        assert jnp.allclose(others_s[0], _reference(y, mode, params), atol=1e-5, rtol=1e-5)
        assert jnp.allclose(others_s[1], _reference(z, mode, params), atol=1e-5, rtol=1e-5)

    jax.block_until_ready(out)
    print("KERNEL_OK")
</pallas_src>

<mosaic_0001>
module attributes {stable_mosaic.version = 11 : i64} {
  func.func @_translate_kernel(%arg0: i32, %arg1: memref<8x16x16xf32, #tpu.memory_space<vmem>>, %arg2: memref<8x16x16xf32, #tpu.memory_space<vmem>>, %arg3: memref<8x16x16xf32, #tpu.memory_space<vmem>>) attributes {dimension_semantics = [#tpu.dimension_semantics<parallel>], iteration_bounds = array<i64: 1>, scalar_prefetch = 0 : i64, scratch_operands = 1 : i64, tpu.core_type = #tpu.core_type<tc>, window_params = [{transform_indices = @transform_0, window_bounds = array<i64: 8, 16, 16>}, {transform_indices = @transform_1, window_bounds = array<i64: 8, 16, 16>}]} {
    %c0 = arith.constant 0 : index
    %c0_0 = arith.constant 0 : index
    %c0_1 = arith.constant 0 : index
    %0 = vector.load %arg1[%c0, %c0_0, %c0_1] : memref<8x16x16xf32, #tpu.memory_space<vmem>>, vector<8x16x16xf32>
    %cst = arith.constant 0.000000e+00 : f32
    %1 = vector.broadcast %cst : f32 to vector<8x16x16xf32>
    %c0_2 = arith.constant 0 : index
    %c0_3 = arith.constant 0 : index
    %c0_4 = arith.constant 0 : index
    %2 = vector.load %arg3[%c0_2, %c0_3, %c0_4] : memref<8x16x16xf32, #tpu.memory_space<vmem>>, vector<8x16x16xf32>
    tpu.vector_store %arg3[%c0_2, %c0_3, %c0_4], %1 {strides = array<i32>} : memref<8x16x16xf32, #tpu.memory_space<vmem>>, vector<8x16x16xf32>,
    %c0_5 = arith.constant 0 : index
    %c0_6 = arith.constant 0 : index
    %c3 = arith.constant 3 : index
    %3 = vector.load %arg3[%c0_5, %c0_6, %c3] : memref<8x16x16xf32, #tpu.memory_space<vmem>>, vector<8x16x13xf32>
    %4 = vector.extract_strided_slice %0 {offsets = [0, 0, 0], sizes = [8, 16, 13], strides = [1, 1, 1]} : vector<8x16x16xf32> to vector<8x16x13xf32>
    %cst_7 = arith.constant 0.476362258 : f32
    %5 = vector.broadcast %cst_7 : f32 to vector<8x16x13xf32>
    %6 = arith.mulf %5, %4 : vector<8x16x13xf32>
    %7 = arith.addf %3, %6 : vector<8x16x13xf32>
    %c0_8 = arith.constant 0 : index
    %c0_9 = arith.constant 0 : index
    %c3_10 = arith.constant 3 : index
    %8 = vector.load %arg3[%c0_8, %c0_9, %c3_10] : memref<8x16x16xf32, #tpu.memory_space<vmem>>, vector<8x16x13xf32>
    tpu.vector_store %arg3[%c0_8, %c0_9, %c3_10], %7 {strides = array<i32>} : memref<8x16x16xf32, #tpu.memory_space<vmem>>, vector<8x16x13xf32>,
    %c0_11 = arith.constant 0 : index
    %c0_12 = arith.constant 0 : index
    %c2 = arith.constant 2 : index
    %9 = vector.load %arg3[%c0_11, %c0_12, %c2] : memref<8x16x16xf32, #tpu.memory_space<vmem>>, vector<8x16x14xf32>
    %10 = vector.extract_strided_slice %0 {offsets = [0, 0, 0], sizes = [8, 16, 14], strides = [1, 1, 1]} : vector<8x16x16xf32> to vector<8x16x14xf32>
    %cst_13 = arith.constant 0.523637712 : f32
    %11 = vector.broadcast %cst_13 : f32 to vector<8x16x14xf32>
    %12 = arith.mulf %11, %10 : vector<8x16x14xf32>
    %13 = arith.addf %9, %12 : vector<8x16x14xf32>
    %c0_14 = arith.constant 0 : index
    %c0_15 = arith.constant 0 : index
    %c2_16 = arith.constant 2 : index
    %14 = vector.load %arg3[%c0_14, %c0_15, %c2_16] : memref<8x16x16xf32, #tpu.memory_space<vmem>>, vector<8x16x14xf32>
    tpu.vector_store %arg3[%c0_14, %c0_15, %c2_16], %13 {strides = array<i32>} : memref<8x16x16xf32, #tpu.memory_space<vmem>>, vector<8x16x14xf32>,
    %c0_17 = arith.constant 0 : index
    %c0_18 = arith.constant 0 : index
    %c0_19 = arith.constant 0 : index
    %15 = vector.load %arg3[%c0_17, %c0_18, %c0_19] : memref<8x16x16xf32, #tpu.memory_space<vmem>>, vector<8x16x16xf32>
    %cst_20 = arith.constant 0.000000e+00 : f32
    %16 = vector.broadcast %cst_20 : f32 to vector<8x16x16xf32>
    %c0_21 = arith.constant 0 : index
    %c0_22 = arith.constant 0 : index
    %c0_23 = arith.constant 0 : index
    %17 = vector.load %arg2[%c0_21, %c0_22, %c0_23] : memref<8x16x16xf32, #tpu.memory_space<vmem>>, vector<8x16x16xf32>
    tpu.vector_store %arg2[%c0_21, %c0_22, %c0_23], %16 {strides = array<i32>} : memref<8x16x16xf32, #tpu.memory_space<vmem>>, vector<8x16x16xf32>,
    %c0_24 = arith.constant 0 : index
    %c0_25 = arith.constant 0 : index
    %c0_26 = arith.constant 0 : index
    %18 = vector.load %arg2[%c0_24, %c0_25, %c0_26] : memref<8x16x16xf32, #tpu.memory_space<vmem>>, vector<8x16x16xf32>
    %cst_27 = arith.constant 0.237487182 : f32
    %19 = vector.broadcast %cst_27 : f32 to vector<8x16x16xf32>
    %20 = arith.mulf %19, %15 : vector<8x16x16xf32>
    %21 = arith.addf %18, %20 : vector<8x16x16xf32>
    %c0_28 = arith.constant 0 : index
    %c0_29 = arith.constant 0 : index
    %c0_30 = arith.constant 0 : index
    %22 = vector.load %arg2[%c0_28, %c0_29, %c0_30] : memref<8x16x16xf32, #tpu.memory_space<vmem>>, vector<8x16x16xf32>
    tpu.vector_store %arg2[%c0_28, %c0_29, %c0_30], %21 {strides = array<i32>} : memref<8x16x16xf32, #tpu.memory_space<vmem>>, vector<8x16x16xf32>,
    %c0_31 = arith.constant 0 : index
    %c0_32 = arith.constant 0 : index
    %c0_33 = arith.constant 0 : index
    %23 = vector.load %arg2[%c0_31, %c0_32, %c0_33] : memref<8x16x16xf32, #tpu.memory_space<vmem>>, vector<8x15x16xf32>
    %24 = vector.extract_strided_slice %15 {offsets = [0, 1, 0], sizes = [8, 15, 16], strides = [1, 1, 1]} : vector<8x16x16xf32> to vector<8x15x16xf32>
    %cst_34 = arith.constant 0.762512803 : f32
    %25 = vector.broadcast %cst_34 : f32 to vector<8x15x16xf32>
    %26 = arith.mulf %25, %24 : vector<8x15x16xf32>
    %27 = arith.addf %23, %26 : vector<8x15x16xf32>
    %c0_35 = arith.constant 0 : index
    %c0_36 = arith.constant 0 : index
    %c0_37 = arith.constant 0 : index
    %28 = vector.load %arg2[%c0_35, %c0_36, %c0_37] : memref<8x16x16xf32, #tpu.memory_space<vmem>>, vector<8x15x16xf32>
    tpu.vector_store %arg2[%c0_35, %c0_36, %c0_37], %27 {strides = array<i32>} : memref<8x16x16xf32, #tpu.memory_space<vmem>>, vector<8x15x16xf32>,
    return
  }
  func.func @transform_0(%arg0: i32) -> (i32, i32, i32) {
    %c0_i32 = arith.constant 0 : i32
    %c0_i32_0 = arith.constant 0 : i32
    %c0_i32_1 = arith.constant 0 : i32
    return %arg0, %c0_i32, %c0_i32_0 : i32, i32, i32
  }
  func.func @transform_1(%arg0: i32) -> (i32, i32, i32) {
    %c0_i32 = arith.constant 0 : i32
    %c0_i32_0 = arith.constant 0 : i32
    %c0_i32_1 = arith.constant 0 : i32
    return %arg0, %c0_i32, %c0_i32_0 : i32, i32, i32
  }
}

</mosaic_0001>

<bundles_post_ra>
// kernel: tpu_custom_call.1
= control target key start
LH: loop header
LB: loop body
LE: loop exit
PB: predicated region body
PF: predicated region fallthrough
CT: control target
= control target key end

     0   :  { %6 = vsyncpa [#allocation4], 0  ;;  %s761_s0 = inlined_call_operand.hbm [shape: f32[8,16,16], index: 0, kind: input, shape index: {}]   ;;  %s762_s1 = inlined_call_operand.hbm [shape: f32[8,16,16], index: 1, kind: output, shape index: {}]  }
   0x1   :  { %7 = vsyncpa [#allocation5], 0  ;;  %s600_s6 = smov [#allocation3]  }
   0x2   :  { %s13_s7 = sshll.u32 %s600_s6, 4  ;;  %s14_s7 = int_to_ptr.vmem [resolvable:$true] %s13_s7 }
   0x3   :  { %s564_s8 = scalar_lea.vmem %s14_s7, 2048  ;;  %p569_p1 = scmp.lt.s32.totalorder %s14_s7, %s14_s7 }
   0x4   :  { %p565_p0 = scmp.ne.s32.totalorder %s14_s7, %s564_s8  ;;  %p570_p2 = scmp.lt.s32.totalorder %s564_s8, %s564_s8 }
   0x6   :  { %p571_p3 = por %p570_p2, %p569_p1 }
   0x8   :  { %p572_p4 = pnand %p571_p3, %p565_p0 }
   0xa   :  { %575 = shalt.err (!%p572_p4)
}
   0xb   :  { %s601_s9 = smov 128   ;;  %s602_s10 = smov 8  }
   0xc   :  { %19 = dma.hbm_to_vmem [thread:$0]  %s761_s0, 2048, %s14_s7, [#allocation4], %s601_s9, %s601_s9, %s602_s10  }
   0xd   :  { %596 = dma.done.wait [#allocation4], 2048  }
   0xe   :  { %597 = vsyncadd [#allocation4], 4294965248  ;;  %vm39_vm0 = vcmask 130048   ;;  %v603_v0 = vmov 0.0   ;;  %v25_v1 = vld [vmem:[#allocation3 + $0x10] sm:$0xff]  ;;  %v23_v2 = vld [vmem:[#allocation3] sm:$0xff] }
   0xf   :  { %42 = vst.msk [vmem:[#allocation2 + $0x10] sm:$0xff] %vm39_vm0, %v603_v0  ;;  %40 = vst.msk [vmem:[#allocation2] sm:$0xff] %vm39_vm0, %v603_v0  ;;  %v26_v3 = vld [vmem:[#allocation3 + $0x18] sm:$0xff]  ;;  %v74_v4 = vmul.f32 0.47636226, %v25_v1  ;;  %v24_v6 = vld [vmem:[#allocation3 + $0x8] sm:$0xff] }
  0x10   :  { %41 = vst.msk [vmem:[#allocation2 + $0x8] sm:$0xff] %vm39_vm0, %v603_v0  ;;  %43 = vst.msk [vmem:[#allocation2 + $0x18] sm:$0xff] %vm39_vm0, %v603_v0  ;;  %v72_v5 = vmul.f32 0.47636226, %v23_v2  ;;  %s604_s0 = smov 3   ;;  %v28_v9 = vld [vmem:[#allocation3 + $0x28] sm:$0xff] }
  0x11   :  { %44 = vst.msk [vmem:[#allocation2 + $0x20] sm:$0xff] %vm39_vm0, %v603_v0  ;;  %45 = vst.msk [vmem:[#allocation2 + $0x28] sm:$0xff] %vm39_vm0, %v603_v0  ;;  %108 = vrot.lane.b32.xlu1 %v74_v4, %s604_s0  ;;  %v75_v7 = vmul.f32 0.47636226, %v26_v3  ;;  %v73_v8 = vmul.f32 0.47636226, %v24_v6 }
  0x12   :  { %46 = vst.msk [vmem:[#allocation2 + $0x30] sm:$0xff] %vm39_vm0, %v603_v0  ;;  %47 = vst.msk [vmem:[#allocation2 + $0x38] sm:$0xff] %vm39_vm0, %v603_v0  ;;  %104 = vrot.lane.b32.xlu0 %v72_v5, %s604_s0  ;;  %v27_v10 = vld [vmem:[#allocation3 + $0x20] sm:$0xff]  ;;  %v77_v11 = vmul.f32 0.47636226, %v28_v9  ;;  %v30_v13 = vld [vmem:[#allocation3 + $0x38] sm:$0xff] }
  0x13   :  { %48 = vst.msk [vmem:[#allocation2 + $0x40] sm:$0xff] %vm39_vm0, %v603_v0  ;;  %49 = vst.msk [vmem:[#allocation2 + $0x48] sm:$0xff] %vm39_vm0, %v603_v0  ;;  %v76_v12 = vmul.f32 0.47636226, %v27_v10  ;;  %v29_v14 = vld [vmem:[#allocation3 + $0x30] sm:$0xff]  ;;  %v32_v17 = vld [vmem:[#allocation3 + $0x48] sm:$0xff] }
  0x14   :  { %50 = vst.msk [vmem:[#allocation2 + $0x50] sm:$0xff] %vm39_vm0, %v603_v0  ;;  %51 = vst.msk [vmem:[#allocation2 + $0x58] sm:$0xff] %vm39_vm0, %v603_v0  ;;  %v79_v15 = vmul.f32 0.47636226, %v30_v13  ;;  %v78_v16 = vmul.f32 0.47636226, %v29_v14 }
  0x15   :  { %52 = vst.msk [vmem:[#allocation2 + $0x60] sm:$0xff] %vm39_vm0, %v603_v0  ;;  %53 = vst.msk [vmem:[#allocation2 + $0x68] sm:$0xff] %vm39_vm0, %v603_v0  ;;  %110 = vrot.lane.b32.xlu1 %v75_v7, %s604_s0  ;;  %v31_v18 = vld [vmem:[#allocation3 + $0x40] sm:$0xff]  ;;  %v81_v19 = vmul.f32 0.47636226, %v32_v17  ;;  %v34_v21 = vld [vmem:[#allocation3 + $0x58] sm:$0xff] }
  0x16   :  { %54 = vst.msk [vmem:[#allocation2 + $0x70] sm:$0xff] %vm39_vm0, %v603_v0  ;;  %55 = vst.msk [vmem:[#allocation2 + $0x78] sm:$0xff] %vm39_vm0, %v603_v0  ;;  %106 = vrot.lane.b32.xlu0 %v73_v8, %s604_s0  ;;  %v80_v20 = vmul.f32 0.47636226, %v31_v18  ;;  %v33_v22 = vld [vmem:[#allocation3 + $0x50] sm:$0xff]  ;;  %v36_v25 = vld [vmem:[#allocation3 + $0x68] sm:$0xff] }
  0x17   :  { %330 = vst.msk [vmem:[#allocation6] sm:$0xff] %vm39_vm0, %v603_v0  ;;  %331 = vst.msk [vmem:[#allocation6 + $0x8] sm:$0xff] %vm39_vm0, %v603_v0  ;;  %v83_v23 = vmul.f32 0.47636226, %v34_v21  ;;  %v82_v24 = vmul.f32 0.47636226, %v33_v22 }
  0x18   :  { %332 = vst.msk [vmem:[#allocation6 + $0x10] sm:$0xff] %vm39_vm0, %v603_v0  ;;  %333 = vst.msk [vmem:[#allocation6 + $0x18] sm:$0xff] %vm39_vm0, %v603_v0  ;;  %v35_v26 = vld [vmem:[#allocation3 + $0x60] sm:$0xff]  ;;  %v85_v27 = vmul.f32 0.47636226, %v36_v25  ;;  %v38_v29 = vld [vmem:[#allocation3 + $0x78] sm:$0xff] }
  0x19   :  { %334 = vst.msk [vmem:[#allocation6 + $0x20] sm:$0xff] %vm39_vm0, %v603_v0  ;;  %335 = vst.msk [vmem:[#allocation6 + $0x28] sm:$0xff] %vm39_vm0, %v603_v0  ;;  %114 = vrot.lane.b32.xlu1 %v77_v11, %s604_s0  ;;  %v84_v28 = vmul.f32 0.47636226, %v35_v26  ;;  %v37_v30 = vld [vmem:[#allocation3 + $0x70] sm:$0xff]  ;;  %s605_s13 = smov 2  }
  0x1a   :  { %336 = vst.msk [vmem:[#allocation6 + $0x30] sm:$0xff] %vm39_vm0, %v603_v0  ;;  %337 = vst.msk [vmem:[#allocation6 + $0x38] sm:$0xff] %vm39_vm0, %v603_v0  ;;  %112 = vrot.lane.b32.xlu0 %v76_v12, %s604_s0  ;;  %v87_v31 = vmul.f32 0.47636226, %v38_v29  ;;  %v86_v32 = vmul.f32 0.47636226, %v37_v30 }
  0x1b   :  { %338 = vst.msk [vmem:[#allocation6 + $0x40] sm:$0xff] %vm39_vm0, %v603_v0  ;;  %339 = vst.msk [vmem:[#allocation6 + $0x48] sm:$0xff] %vm39_vm0, %v603_v0  ;;  %v201_v33 = vmul.f32 0.5236377, %v23_v2  ;;  %v202_v34 = vmul.f32 0.5236377, %v24_v6 }
  0x1c   :  { %340 = vst.msk [vmem:[#allocation6 + $0x50] sm:$0xff] %vm39_vm0, %v603_v0  ;;  %341 = vst.msk [vmem:[#allocation6 + $0x58] sm:$0xff] %vm39_vm0, %v603_v0  ;;  %v203_v35 = vmul.f32 0.5236377, %v25_v1  ;;  %v204_v36 = vmul.f32 0.5236377, %v26_v3 }
  0x1d   :  { %342 = vst.msk [vmem:[#allocation6 + $0x60] sm:$0xff] %vm39_vm0, %v603_v0  ;;  %343 = vst.msk [vmem:[#allocation6 + $0x68] sm:$0xff] %vm39_vm0, %v603_v0  ;;  %118 = vrot.lane.b32.xlu1 %v79_v15, %s604_s0  ;;  %v206_v37 = vmul.f32 0.5236377, %v28_v9  ;;  %v205_v38 = vmul.f32 0.5236377, %v27_v10 }
  0x1e   :  { %344 = vst.msk [vmem:[#allocation6 + $0x70] sm:$0xff] %vm39_vm0, %v603_v0  ;;  %345 = vst.msk [vmem:[#allocation6 + $0x78] sm:$0xff] %vm39_vm0, %v603_v0  ;;  %116 = vrot.lane.b32.xlu0 %v78_v16, %s604_s0  ;;  %v208_v39 = vmul.f32 0.5236377, %v30_v13  ;;  %v207_v40 = vmul.f32 0.5236377, %v29_v14 }
  0x1f   :  { %v210_v41 = vmul.f32 0.5236377, %v32_v17  ;;  %v209_v42 = vmul.f32 0.5236377, %v31_v18  ;;  %v212_v43 = vmul.f32 0.5236377, %v34_v21 }
  0x20   :  { %v211_v44 = vmul.f32 0.5236377, %v33_v22  ;;  %v214_v45 = vmul.f32 0.5236377, %v36_v25  ;;  %v213_v46 = vmul.f32 0.5236377, %v35_v26 }
  0x21   :  { %122 = vrot.lane.b32.xlu1 %v81_v19, %s604_s0  ;;  %v216_v47 = vmul.f32 0.5236377, %v38_v29  ;;  %v215_v48 = vmul.f32 0.5236377, %v37_v30  ;;  %v58_v49 = vld [vmem:[#allocation2 + $0x10] sm:$0xff]  ;;  %v56_v50 = vld [vmem:[#allocation2] sm:$0xff] }
  0x22   :  { %120 = vrot.lane.b32.xlu0 %v80_v20, %s604_s0  ;;  %vm168_vm1 = vcmask 130072   ;;  %v59_v55 = vld [vmem:[#allocation2 + $0x18] sm:$0xff]  ;;  %v57_v56 = vld [vmem:[#allocation2 + $0x8] sm:$0xff]  ;;  %v60_v62 = vld [vmem:[#allocation2 + $0x20] sm:$0xff]  ;;  %vm297_vm2 = vcmask 130064   ;;  %vm458_vm3 = vcmask 1046528  }
  0x23   :  { %v61_v61 = vld [vmem:[#allocation2 + $0x28] sm:$0xff]  ;;  %v63_v3 = vld [vmem:[#allocation2 + $0x38] sm:$0xff]  ;;  %v62_v4 = vld [vmem:[#allocation2 + $0x30] sm:$0xff]  ;;  %vm516_vm4 = vcmask 129024   ;;  %s606_s14 = smov [#allocation6]  }
  0x24   :  { %v65_v9 = vld [vmem:[#allocation2 + $0x48] sm:$0xff]  ;;  %v64_v10 = vld [vmem:[#allocation2 + $0x40] sm:$0xff]  ;;  %v67_v15 = vld [vmem:[#allocation2 + $0x58] sm:$0xff]  ;;  %s537_s15 = sshll.u32 %s606_s14, 4  ;;  %s538_s15 = int_to_ptr.vmem [resolvable:$true] %s537_s15 }
  0x25   :  { %126 = vrot.lane.b32.xlu1 %v83_v23, %s604_s0  ;;  %v66_v16 = vld [vmem:[#allocation2 + $0x50] sm:$0xff]  ;;  %v69_v21 = vld [vmem:[#allocation2 + $0x68] sm:$0xff]  ;;  %v68_v22 = vld [vmem:[#allocation2 + $0x60] sm:$0xff]  ;;  %s576_s16 = scalar_lea.vmem %s538_s15, 2048  ;;  %p581_p6 = scmp.lt.s32.totalorder %s538_s15, %s538_s15 }
  0x26   :  { %124 = vrot.lane.b32.xlu0 %v82_v24, %s604_s0  ;;  %p577_p5 = scmp.ne.s32.totalorder %s538_s15, %s576_s16  ;;  %p582_p7 = scmp.lt.s32.totalorder %s576_s16, %s576_s16 }
  0x28   :  { %p583_p8 = por %p582_p7, %p581_p6 }
  0x29   :  { %130 = vrot.lane.b32.xlu1 %v85_v27, %s604_s0  ;;  %v71_v27 = vld [vmem:[#allocation2 + $0x78] sm:$0xff] }
  0x2a   :  { %128 = vrot.lane.b32.xlu0 %v84_v28, %s604_s0  ;;  %v70_v28 = vld [vmem:[#allocation2 + $0x70] sm:$0xff]  ;;  %p584_p9 = pnand %p583_p8, %p577_p5 }
  0x2d   :  { %134 = vrot.lane.b32.xlu1 %v87_v31, %s604_s0 }
  0x2e   :  { %132 = vrot.lane.b32.xlu0 %v86_v32, %s604_s0 }
  0x31   :  { %235 = vrot.lane.b32.xlu1 %v202_v34, %s605_s13 }
  0x32   :  { %233 = vrot.lane.b32.xlu0 %v201_v33, %s605_s13 }
  0x35   :  { %239 = vrot.lane.b32.xlu1 %v204_v36, %s605_s13 }
  0x36   :  { %237 = vrot.lane.b32.xlu0 %v203_v35, %s605_s13 }
  0x39   :  { %243 = vrot.lane.b32.xlu1 %v206_v37, %s605_s13 }
  0x3a   :  { %241 = vrot.lane.b32.xlu0 %v205_v38, %s605_s13 }
  0x3d   :  { %247 = vrot.lane.b32.xlu1 %v208_v39, %s605_s13 }
  0x3e   :  { %245 = vrot.lane.b32.xlu0 %v207_v40, %s605_s13 }
  0x41   :  { %251 = vrot.lane.b32.xlu1 %v210_v41, %s605_s13 }
  0x42   :  { %249 = vrot.lane.b32.xlu0 %v209_v42, %s605_s13 }
  0x45   :  { %255 = vrot.lane.b32.xlu1 %v212_v43, %s605_s13 }
  0x46   :  { %253 = vrot.lane.b32.xlu0 %v211_v44, %s605_s13 }
  0x49   :  { %259 = vrot.lane.b32.xlu1 %v214_v45, %s605_s13 }
  0x4a   :  { %257 = vrot.lane.b32.xlu0 %v213_v46, %s605_s13 }
  0x4d   :  { %263 = vrot.lane.b32.xlu1 %v216_v47, %s605_s13 }
  0x4e   :  { %261 = vrot.lane.b32.xlu0 %v215_v48, %s605_s13 }
  0x83   :  { %v109_v51 = vpop.permute.xlu1 %108 }
  0x84   :  { %v105_v52 = vpop.permute.xlu0 %104  ;;  %v154_v53 = vadd.f32 %v109_v51, %v58_v49  ;;  %v347_v49 = vld [vmem:[#allocation6 + $0x8] sm:$0xff] }
  0x85   :  { %v152_v54 = vadd.f32 %v105_v52, %v56_v50 }
  0x86   :  { %171 = vst.msk [vmem:[#allocation2 + $0x10] sm:$0xff] %vm168_vm1, %v154_v53  ;;  %v346_v53 = vld [vmem:[#allocation6] sm:$0xff] }
  0x87   :  { %169 = vst.msk [vmem:[#allocation2] sm:$0xff] %vm168_vm1, %v152_v54  ;;  %v111_v57 = vpop.permute.xlu1 %110 }
  0x88   :  { %v107_v58 = vpop.permute.xlu0 %106  ;;  %v155_v59 = vadd.f32 %v111_v57, %v59_v55 }
  0x89   :  { %v153_v60 = vadd.f32 %v107_v58, %v57_v56 }
  0x8a   :  { %172 = vst.msk [vmem:[#allocation2 + $0x18] sm:$0xff] %vm168_vm1, %v155_v59 }
  0x8b   :  { %170 = vst.msk [vmem:[#allocation2 + $0x8] sm:$0xff] %vm168_vm1, %v153_v60  ;;  %v115_v63 = vpop.permute.xlu1 %114 }
  0x8c   :  { %v113_v0 = vpop.permute.xlu0 %112  ;;  %v157_v1 = vadd.f32 %v115_v63, %v61_v61  ;;  %v348_v63 = vld [vmem:[#allocation6 + $0x10] sm:$0xff] }
  0x8d   :  { %v156_v2 = vadd.f32 %v113_v0, %v60_v62  ;;  %v187_v41 = vld [vmem:[#allocation2 + $0x10] sm:$0xff]  ;;  %v349_v62 = vld [vmem:[#allocation6 + $0x18] sm:$0xff] }
  0x8e   :  { %174 = vst.msk [vmem:[#allocation2 + $0x28] sm:$0xff] %vm168_vm1, %v157_v1  ;;  %v185_v35 = vld [vmem:[#allocation2] sm:$0xff] }
  0x8f   :  { %173 = vst.msk [vmem:[#allocation2 + $0x20] sm:$0xff] %vm168_vm1, %v156_v2  ;;  %v119_v5 = vpop.permute.xlu1 %118 }
  0x90   :  { %v117_v6 = vpop.permute.xlu0 %116  ;;  %v159_v7 = vadd.f32 %v119_v5, %v63_v3 }
  0x91   :  { %v158_v8 = vadd.f32 %v117_v6, %v62_v4  ;;  %v188_v39 = vld [vmem:[#allocation2 + $0x18] sm:$0xff] }
  0x92   :  { %176 = vst.msk [vmem:[#allocation2 + $0x38] sm:$0xff] %vm168_vm1, %v159_v7  ;;  %v186_v34 = vld [vmem:[#allocation2 + $0x8] sm:$0xff] }
  0x93   :  { %175 = vst.msk [vmem:[#allocation2 + $0x30] sm:$0xff] %vm168_vm1, %v158_v8  ;;  %v123_v11 = vpop.permute.xlu1 %122 }
  0x94   :  { %v121_v12 = vpop.permute.xlu0 %120  ;;  %v161_v13 = vadd.f32 %v123_v11, %v65_v9 }
  0x95   :  { %v160_v14 = vadd.f32 %v121_v12, %v64_v10  ;;  %v190_v45 = vld [vmem:[#allocation2 + $0x28] sm:$0xff] }
  0x96   :  { %178 = vst.msk [vmem:[#allocation2 + $0x48] sm:$0xff] %vm168_vm1, %v161_v13  ;;  %v189_v47 = vld [vmem:[#allocation2 + $0x20] sm:$0xff] }
  0x97   :  { %177 = vst.msk [vmem:[#allocation2 + $0x40] sm:$0xff] %vm168_vm1, %v160_v14  ;;  %v127_v17 = vpop.permute.xlu1 %126 }
  0x98   :  { %v125_v18 = vpop.permute.xlu0 %124  ;;  %v163_v19 = vadd.f32 %v127_v17, %v67_v15 }
  0x99   :  { %v162_v20 = vadd.f32 %v125_v18, %v66_v16  ;;  %v192_v57 = vld [vmem:[#allocation2 + $0x38] sm:$0xff]  ;;  %v351_v16 = vld [vmem:[#allocation6 + $0x28] sm:$0xff] }
  0x9a   :  { %180 = vst.msk [vmem:[#allocation2 + $0x58] sm:$0xff] %vm168_vm1, %v163_v19  ;;  %v191_v1 = vld [vmem:[#allocation2 + $0x30] sm:$0xff] }
  0x9b   :  { %179 = vst.msk [vmem:[#allocation2 + $0x50] sm:$0xff] %vm168_vm1, %v162_v20  ;;  %v131_v23 = vpop.permute.xlu1 %130 }
  0x9c   :  { %v129_v24 = vpop.permute.xlu0 %128  ;;  %v165_v25 = vadd.f32 %v131_v23, %v69_v21 }
  0x9d   :  { %v164_v26 = vadd.f32 %v129_v24, %v68_v22  ;;  %v194_v11 = vld [vmem:[#allocation2 + $0x48] sm:$0xff]  ;;  %v350_v22 = vld [vmem:[#allocation6 + $0x20] sm:$0xff] }
  0x9e   :  { %182 = vst.msk [vmem:[#allocation2 + $0x68] sm:$0xff] %vm168_vm1, %v165_v25  ;;  %v193_v18 = vld [vmem:[#allocation2 + $0x40] sm:$0xff] }
  0x9f   :  { %181 = vst.msk [vmem:[#allocation2 + $0x60] sm:$0xff] %vm168_vm1, %v164_v26  ;;  %v135_v29 = vpop.permute.xlu1 %134 }
  0xa0   :  { %v133_v30 = vpop.permute.xlu0 %132  ;;  %v167_v31 = vadd.f32 %v135_v29, %v71_v27 }
  0xa1   :  { %v166_v32 = vadd.f32 %v133_v30, %v70_v28  ;;  %v196_v29 = vld [vmem:[#allocation2 + $0x58] sm:$0xff] }
  0xa2   :  { %184 = vst.msk [vmem:[#allocation2 + $0x78] sm:$0xff] %vm168_vm1, %v167_v31 }
  0xa3   :  { %183 = vst.msk [vmem:[#allocation2 + $0x70] sm:$0xff] %vm168_vm1, %v166_v32  ;;  %v236_v33 = vpop.permute.xlu1 %235 }
  0xa4   :  { %v234_v36 = vpop.permute.xlu0 %233  ;;  %v282_v37 = vadd.f32 %v236_v33, %v186_v34 }
  0xa5   :  { %v281_v38 = vadd.f32 %v234_v36, %v185_v35  ;;  %v353_v35 = vld [vmem:[#allocation6 + $0x38] sm:$0xff] }
  0xa6   :  { %299 = vst.msk [vmem:[#allocation2 + $0x8] sm:$0xff] %vm297_vm2, %v282_v37  ;;  %v195_v37 = vld [vmem:[#allocation2 + $0x50] sm:$0xff] }
  0xa7   :  { %298 = vst.msk [vmem:[#allocation2] sm:$0xff] %vm297_vm2, %v281_v38  ;;  %v240_v40 = vpop.permute.xlu1 %239 }
  0xa8   :  { %v238_v42 = vpop.permute.xlu0 %237  ;;  %v284_v43 = vadd.f32 %v240_v40, %v188_v39 }
  0xa9   :  { %v283_v44 = vadd.f32 %v238_v42, %v187_v41 }
  0xaa   :  { %301 = vst.msk [vmem:[#allocation2 + $0x18] sm:$0xff] %vm297_vm2, %v284_v43 }
  0xab   :  { %300 = vst.msk [vmem:[#allocation2 + $0x10] sm:$0xff] %vm297_vm2, %v283_v44  ;;  %v244_v46 = vpop.permute.xlu1 %243 }
  0xac   :  { %v242_v48 = vpop.permute.xlu0 %241  ;;  %v286_v50 = vadd.f32 %v244_v46, %v190_v45 }
  0xad   :  { %v285_v51 = vadd.f32 %v242_v48, %v189_v47  ;;  %v315_v52 = vld [vmem:[#allocation2 + $0x8] sm:$0xff]  ;;  %v352_v47 = vld [vmem:[#allocation6 + $0x30] sm:$0xff] }
  0xae   :  { %v314_v54 = vld [vmem:[#allocation2] sm:$0xff]  ;;  %v363_v55 = vmul.f32 0.23748718, %v315_v52  ;;  %303 = vst.msk [vmem:[#allocation2 + $0x28] sm:$0xff] %vm297_vm2, %v286_v50  ;;  %v427_v2 = vmul.f32 0.7625128, %v315_v52 }
  0xaf   :  { %v362_v56 = vmul.f32 0.23748718, %v314_v54  ;;  %302 = vst.msk [vmem:[#allocation2 + $0x20] sm:$0xff] %vm297_vm2, %v285_v51  ;;  %v248_v58 = vpop.permute.xlu1 %247  ;;  %v426_v3 = vmul.f32 0.7625128, %v314_v54  ;;  %v198_v51 = vld [vmem:[#allocation2 + $0x68] sm:$0xff] }
  0xb0   :  { %v246_v59 = vpop.permute.xlu0 %245  ;;  %v379_v60 = vadd.f32 %v363_v55, %v347_v49  ;;  %v288_v0 = vadd.f32 %v248_v58, %v192_v57  ;;  %v460_v19 = vrot.slane %v427_v2, 1  ;;  %v355_v57 = vld [vmem:[#allocation6 + $0x48] sm:$0xff] }
  0xb1   :  { %v378_v61 = vadd.f32 %v362_v56, %v346_v53  ;;  %v317_v4 = vld [vmem:[#allocation2 + $0x18] sm:$0xff]  ;;  %v287_v6 = vadd.f32 %v246_v59, %v191_v1  ;;  %v459_v20 = vrot.slane %v426_v3, 1  ;;  %v197_v53 = vld [vmem:[#allocation2 + $0x60] sm:$0xff] }
  0xb2   :  { %v316_v5 = vld [vmem:[#allocation2 + $0x10] sm:$0xff]  ;;  %395 = vst.msk [vmem:[#allocation6 + $0x8] sm:$0xff] %vm39_vm0, %v379_v60  ;;  %v365_v7 = vmul.f32 0.23748718, %v317_v4  ;;  %v696_v9 = vmul.f32 0.7625128, %v317_v4 }
  0xb3   :  { %394 = vst.msk [vmem:[#allocation6] sm:$0xff] %vm39_vm0, %v378_v61  ;;  %v364_v8 = vmul.f32 0.23748718, %v316_v5  ;;  %v698_v10 = vmul.f32 0.7625128, %v316_v5  ;;  %v252_v12 = vpop.permute.xlu1 %251  ;;  %v461_v40 = vsel %vm458_vm3, %v459_v20, %v460_v19 }
  0xb4   :  { %305 = vst.msk [vmem:[#allocation2 + $0x38] sm:$0xff] %vm297_vm2, %v288_v0  ;;  %304 = vst.msk [vmem:[#allocation2 + $0x30] sm:$0xff] %vm297_vm2, %v287_v6  ;;  %v250_v13 = vpop.permute.xlu0 %249  ;;  %v381_v14 = vadd.f32 %v365_v7, %v349_v62  ;;  %v290_v17 = vadd.f32 %v252_v12, %v194_v11  ;;  %v463_v27 = vrot.slane %v696_v9, 1  ;;  %v354_v6 = vld [vmem:[#allocation6 + $0x40] sm:$0xff]  ;;  %v199_v12 = vld [vmem:[#allocation2 + $0x70] sm:$0xff] }
  0xb5   :  { %v380_v15 = vadd.f32 %v364_v8, %v348_v63  ;;  %v319_v21 = vld [vmem:[#allocation2 + $0x28] sm:$0xff]  ;;  %v289_v24 = vadd.f32 %v250_v13, %v193_v18  ;;  %v462_v28 = vrot.slane %v698_v10, 1  ;;  %v200_v10 = vld [vmem:[#allocation2 + $0x78] sm:$0xff] }
  0xb6   :  { %v318_v23 = vld [vmem:[#allocation2 + $0x20] sm:$0xff]  ;;  %397 = vst.msk [vmem:[#allocation6 + $0x18] sm:$0xff] %vm39_vm0, %v381_v14  ;;  %v367_v25 = vmul.f32 0.23748718, %v319_v21  ;;  %v707_v33 = vmul.f32 0.7625128, %v319_v21 }
  0xb7   :  { %396 = vst.msk [vmem:[#allocation6 + $0x10] sm:$0xff] %vm39_vm0, %v380_v15  ;;  %v366_v26 = vmul.f32 0.23748718, %v318_v23  ;;  %v256_v30 = vpop.permute.xlu1 %255  ;;  %v430_v41 = vmul.f32 0.7625128, %v318_v23  ;;  %v464_v62 = vsel %vm458_vm3, %v462_v28, %v463_v27 }
  0xb8   :  { %307 = vst.msk [vmem:[#allocation2 + $0x48] sm:$0xff] %vm297_vm2, %v290_v17  ;;  %306 = vst.msk [vmem:[#allocation2 + $0x40] sm:$0xff] %vm297_vm2, %v289_v24  ;;  %v254_v31 = vpop.permute.xlu0 %253  ;;  %v383_v32 = vadd.f32 %v367_v25, %v351_v16  ;;  %v292_v36 = vadd.f32 %v256_v30, %v196_v29  ;;  %v466_v63 = vrot.slane %v707_v33, 1  ;;  %v357_v16 = vld [vmem:[#allocation6 + $0x58] sm:$0xff]  ;;  %v356_v29 = vld [vmem:[#allocation6 + $0x50] sm:$0xff] }
  0xb9   :  { %v382_v34 = vadd.f32 %v366_v26, %v350_v22  ;;  %v411_v38 = vld [vmem:[#allocation6 + $0x8] sm:$0x7f]  ;;  %v291_v43 = vadd.f32 %v254_v31, %v195_v37  ;;  %v465_v0 = vrot.slane %v430_v41, 1 }
  0xba   :  { %v410_v39 = vld [vmem:[#allocation6] sm:$0xff]  ;;  %v500_v44 = vadd.f32 %v460_v19, %v411_v38  ;;  %399 = vst.msk [vmem:[#allocation6 + $0x28] sm:$0xff] %vm39_vm0, %v383_v32 }
  0xbb   :  { %v321_v42 = vld [vmem:[#allocation2 + $0x38] sm:$0xff]  ;;  %v499_v45 = vadd.f32 %v461_v40, %v410_v39  ;;  %398 = vst.msk [vmem:[#allocation6 + $0x20] sm:$0xff] %vm39_vm0, %v382_v34  ;;  %v320_v48 = vld [vmem:[#allocation2 + $0x30] sm:$0xff]  ;;  %v260_v52 = vpop.permute.xlu1 %259  ;;  %v467_v21 = vsel %vm458_vm3, %v465_v0, %v466_v63 }
  0xbc   :  { %v369_v46 = vmul.f32 0.23748718, %v321_v42  ;;  %309 = vst.msk [vmem:[#allocation2 + $0x58] sm:$0xff] %vm297_vm2, %v292_v36  ;;  %v713_v49 = vmul.f32 0.7625128, %v321_v42  ;;  %308 = vst.msk [vmem:[#allocation2 + $0x50] sm:$0xff] %vm297_vm2, %v291_v43  ;;  %v258_v54 = vpop.permute.xlu0 %257  ;;  %v294_v58 = vadd.f32 %v260_v52, %v198_v51 }
  0xbd   :  { %v368_v50 = vmul.f32 0.23748718, %v320_v48  ;;  %517 = vst.msk [vmem:[#allocation6 + $0x8] sm:$0x7f] %vm516_vm4, %v500_v44  ;;  %v432_v56 = vmul.f32 0.7625128, %v320_v48  ;;  %v293_v59 = vadd.f32 %v258_v54, %v197_v53 }
  0xbe   :  { %515 = vst.msk [vmem:[#allocation6] sm:$0xff] %vm39_vm0, %v499_v45  ;;  %v385_v55 = vadd.f32 %v369_v46, %v353_v35  ;;  %v413_v60 = vld [vmem:[#allocation6 + $0x18] sm:$0x7f]  ;;  %v412_v61 = vld [vmem:[#allocation6 + $0x10] sm:$0xff]  ;;  %v469_v8 = vrot.slane %v713_v49, 1  ;;  %v359_v35 = vld [vmem:[#allocation6 + $0x68] sm:$0xff] }
  0xbf   :  { %v384_v1 = vadd.f32 %v368_v50, %v352_v47  ;;  %v323_v2 = vld [vmem:[#allocation2 + $0x48] sm:$0xff]  ;;  %v502_v3 = vadd.f32 %v463_v27, %v413_v60  ;;  %v501_v4 = vadd.f32 %v464_v62, %v412_v61  ;;  %v322_v7 = vld [vmem:[#allocation2 + $0x40] sm:$0xff]  ;;  %311 = vst.msk [vmem:[#allocation2 + $0x68] sm:$0xff] %vm297_vm2, %v294_v58  ;;  %310 = vst.msk [vmem:[#allocation2 + $0x60] sm:$0xff] %vm297_vm2, %v293_v59  ;;  %v264_v11 = vpop.permute.xlu1 %263  ;;  %v468_v14 = vrot.slane %v432_v56, 1 }
  0xc0   :  { %401 = vst.msk [vmem:[#allocation6 + $0x38] sm:$0xff] %vm39_vm0, %v385_v55  ;;  %v371_v5 = vmul.f32 0.23748718, %v323_v2  ;;  %v370_v9 = vmul.f32 0.23748718, %v322_v7  ;;  %v262_v13 = vpop.permute.xlu0 %261  ;;  %v296_v17 = vadd.f32 %v264_v11, %v200_v10  ;;  %v358_v46 = vld [vmem:[#allocation6 + $0x60] sm:$0xff] }
  0xc1   :  { %400 = vst.msk [vmem:[#allocation6 + $0x30] sm:$0xff] %vm39_vm0, %v384_v1  ;;  %518 = vst.msk [vmem:[#allocation6 + $0x10] sm:$0xff] %vm39_vm0, %v501_v4  ;;  %v295_v18 = vadd.f32 %v262_v13, %v199_v12  ;;  %v415_v19 = vld [vmem:[#allocation6 + $0x28] sm:$0x7f]  ;;  %v435_v22 = vmul.f32 0.7625128, %v323_v2  ;;  %v470_v37 = vsel %vm458_vm3, %v468_v14, %v469_v8 }
  0xc2   :  { %519 = vst.msk [vmem:[#allocation6 + $0x18] sm:$0x7f] %vm516_vm4, %v502_v3  ;;  %v387_v15 = vadd.f32 %v371_v5, %v355_v57  ;;  %v414_v20 = vld [vmem:[#allocation6 + $0x20] sm:$0xff]  ;;  %v386_v23 = vadd.f32 %v370_v9, %v354_v6  ;;  %v504_v25 = vadd.f32 %v466_v63, %v415_v19  ;;  %v434_v27 = vmul.f32 0.7625128, %v322_v7  ;;  %v361_v52 = vld [vmem:[#allocation6 + $0x78] sm:$0xff] }
  0xc3   :  { %v325_v24 = vld [vmem:[#allocation2 + $0x58] sm:$0xff]  ;;  %v503_v26 = vadd.f32 %v467_v21, %v414_v20  ;;  %v324_v30 = vld [vmem:[#allocation2 + $0x50] sm:$0xff]  ;;  %313 = vst.msk [vmem:[#allocation2 + $0x78] sm:$0xff] %vm297_vm2, %v296_v17  ;;  %312 = vst.msk [vmem:[#allocation2 + $0x70] sm:$0xff] %vm297_vm2, %v295_v18  ;;  %v472_v43 = vrot.slane %v435_v22, 1 }
  0xc4   :  { %403 = vst.msk [vmem:[#allocation6 + $0x48] sm:$0xff] %vm39_vm0, %v387_v15  ;;  %v373_v28 = vmul.f32 0.23748718, %v325_v24  ;;  %402 = vst.msk [vmem:[#allocation6 + $0x40] sm:$0xff] %vm39_vm0, %v386_v23  ;;  %v372_v31 = vmul.f32 0.23748718, %v324_v30 }
  0xc5   :  { %521 = vst.msk [vmem:[#allocation6 + $0x28] sm:$0x7f] %vm516_vm4, %v504_v25  ;;  %v437_v33 = vmul.f32 0.7625128, %v325_v24  ;;  %v436_v34 = vmul.f32 0.7625128, %v324_v30 }
  0xc6   :  { %520 = vst.msk [vmem:[#allocation6 + $0x20] sm:$0xff] %vm39_vm0, %v503_v26  ;;  %v389_v32 = vadd.f32 %v373_v28, %v357_v16  ;;  %v388_v38 = vadd.f32 %v372_v31, %v356_v29  ;;  %v327_v39 = vld [vmem:[#allocation2 + $0x68] sm:$0xff]  ;;  %v326_v40 = vld [vmem:[#allocation2 + $0x60] sm:$0xff]  ;;  %v471_v44 = vrot.slane %v434_v27, 1  ;;  %v360_v63 = vld [vmem:[#allocation6 + $0x70] sm:$0xff] }
  0xc7   :  { %v417_v36 = vld [vmem:[#allocation6 + $0x38] sm:$0x7f]  ;;  %v375_v45 = vmul.f32 0.23748718, %v327_v39  ;;  %v374_v48 = vmul.f32 0.23748718, %v326_v40 }
  0xc8   :  { %v506_v41 = vadd.f32 %v469_v8, %v417_v36  ;;  %v416_v42 = vld [vmem:[#allocation6 + $0x30] sm:$0xff]  ;;  %405 = vst.msk [vmem:[#allocation6 + $0x58] sm:$0xff] %vm39_vm0, %v389_v32  ;;  %404 = vst.msk [vmem:[#allocation6 + $0x50] sm:$0xff] %vm39_vm0, %v388_v38  ;;  %v475_v49 = vrot.slane %v437_v33, 1  ;;  %v474_v50 = vrot.slane %v436_v34, 1  ;;  %v473_v60 = vsel %vm458_vm3, %v471_v44, %v472_v43 }
  0xc9   :  { %v505_v47 = vadd.f32 %v470_v37, %v416_v42  ;;  %v391_v51 = vadd.f32 %v375_v45, %v359_v35  ;;  %v439_v54 = vmul.f32 0.7625128, %v327_v39  ;;  %v390_v55 = vadd.f32 %v374_v48, %v358_v46 }
  0xca   :  { %523 = vst.msk [vmem:[#allocation6 + $0x38] sm:$0x7f] %vm516_vm4, %v506_v41  ;;  %v329_v56 = vld [vmem:[#allocation2 + $0x78] sm:$0xff]  ;;  %v328_v57 = vld [vmem:[#allocation2 + $0x70] sm:$0xff]  ;;  %v438_v61 = vmul.f32 0.7625128, %v326_v40  ;;  %v476_v4 = vsel %vm458_vm3, %v474_v50, %v475_v49 }
  0xcb   :  { %522 = vst.msk [vmem:[#allocation6 + $0x30] sm:$0xff] %vm39_vm0, %v505_v47  ;;  %v419_v53 = vld [vmem:[#allocation6 + $0x48] sm:$0x7f]  ;;  %v418_v59 = vld [vmem:[#allocation6 + $0x40] sm:$0xff]  ;;  %407 = vst.msk [vmem:[#allocation6 + $0x68] sm:$0xff] %vm39_vm0, %v391_v51  ;;  %v478_v5 = vrot.slane %v439_v54, 1 }
  0xcc   :  { %v508_v58 = vadd.f32 %v472_v43, %v419_v53  ;;  %v377_v62 = vmul.f32 0.23748718, %v329_v56  ;;  %v507_v0 = vadd.f32 %v473_v60, %v418_v59  ;;  %406 = vst.msk [vmem:[#allocation6 + $0x60] sm:$0xff] %vm39_vm0, %v390_v55  ;;  %v376_v1 = vmul.f32 0.23748718, %v328_v57 }
  0xcd   :  { %v477_v9 = vrot.slane %v438_v61, 1  ;;  %v441_v10 = vmul.f32 0.7625128, %v329_v56  ;;  %v440_v11 = vmul.f32 0.7625128, %v328_v57 }
  0xce   :  { %525 = vst.msk [vmem:[#allocation6 + $0x48] sm:$0x7f] %vm516_vm4, %v508_v58  ;;  %v393_v2 = vadd.f32 %v377_v62, %v361_v52  ;;  %v392_v6 = vadd.f32 %v376_v1, %v360_v63 }
  0xcf   :  { %524 = vst.msk [vmem:[#allocation6 + $0x40] sm:$0xff] %vm39_vm0, %v507_v0  ;;  %v421_v3 = vld [vmem:[#allocation6 + $0x58] sm:$0x7f]  ;;  %v420_v8 = vld [vmem:[#allocation6 + $0x50] sm:$0xff]  ;;  %v479_v16 = vsel %vm458_vm3, %v477_v9, %v478_v5  ;;  %v481_v17 = vrot.slane %v441_v10, 1  ;;  %v480_v18 = vrot.slane %v440_v11, 1 }
  0xd0   :  { %v510_v7 = vadd.f32 %v475_v49, %v421_v3  ;;  %409 = vst.msk [vmem:[#allocation6 + $0x78] sm:$0xff] %vm39_vm0, %v393_v2  ;;  %v509_v12 = vadd.f32 %v476_v4, %v420_v8  ;;  %408 = vst.msk [vmem:[#allocation6 + $0x70] sm:$0xff] %vm39_vm0, %v392_v6 }
  0xd1   :  { %v482_v23 = vsel %vm458_vm3, %v480_v18, %v481_v17 }
  0xd2   :  { %527 = vst.msk [vmem:[#allocation6 + $0x58] sm:$0x7f] %vm516_vm4, %v510_v7  ;;  %v423_v13 = vld [vmem:[#allocation6 + $0x68] sm:$0x7f] }
  0xd3   :  { %526 = vst.msk [vmem:[#allocation6 + $0x50] sm:$0xff] %vm39_vm0, %v509_v12  ;;  %v512_v14 = vadd.f32 %v478_v5, %v423_v13  ;;  %v422_v15 = vld [vmem:[#allocation6 + $0x60] sm:$0xff] }
  0xd4   :  { %v511_v19 = vadd.f32 %v479_v16, %v422_v15 }
  0xd5   :  { %529 = vst.msk [vmem:[#allocation6 + $0x68] sm:$0x7f] %vm516_vm4, %v512_v14 }
  0xd6   :  { %528 = vst.msk [vmem:[#allocation6 + $0x60] sm:$0xff] %vm39_vm0, %v511_v19 }
  0xd7   :  { %v425_v20 = vld [vmem:[#allocation6 + $0x78] sm:$0x7f]  ;;  %v424_v22 = vld [vmem:[#allocation6 + $0x70] sm:$0xff] }
  0xd8   :  { %v514_v21 = vadd.f32 %v481_v17, %v425_v20  ;;  %v513_v24 = vadd.f32 %v482_v23, %v424_v22 }
  0xda   :  { %531 = vst.msk [vmem:[#allocation6 + $0x78] sm:$0x7f] %vm516_vm4, %v514_v21 }
  0xdb   :  { %530 = vst.msk [vmem:[#allocation6 + $0x70] sm:$0xff] %vm39_vm0, %v513_v24 }
  0xdc   :  { %587 = shalt.err (!%p584_p9)
}
  0xdd   :  { %543 = dma.vmem_to_hbm [thread:$0]  %s538_s15, 2048, %s762_s1, [#allocation5], %s601_s9, %s601_s9, %s602_s10  }
  0xde   :  { %598 = dma.done.wait [#allocation5], 2048  }
  0xdf   :  { %599 = vsyncadd [#allocation5], 4294965248 }
  0xe0   :  { %547 = vsyncpa [#allocation4], 1 }
  0xe1   :  { %548 = vsyncpa [#allocation5], 1 }

</bundles_post_ra>
